<compile_context>
chip_gen: v7x
topology: tpu7x:2x2x1
jax: 0.10.0
libtpu: 0.0.40
codegen_flags: <defaults>
</compile_context>

<pallas_src>
import functools

import jax
import jax.numpy as jnp
from jax.experimental import pallas as pl
from jax.experimental.pallas import tpu as pltpu


def _bias_scale_quant_kernel(x_ref, g_ref, o_ref, *, lower_bound, upper_bound):
    # x_ref: (tr, tc)   g_ref: (tr, 1)  -> lane broadcast, no cross-lane relayout
    x = x_ref[...] * g_ref[...]          # == x * gam / 2**(M-1)   (exact pow2 fold)
    x = jnp.floor(x)
    x = jnp.ceil(x * 0.5)                # /2.0 as an exact multiply
    o_ref[...] = jnp.clip(x, lower_bound, upper_bound).astype(o_ref.dtype)


def _block_dim(dim, unit, cap):
    """Block size along one axis.

    Returns a multiple of `unit`, capped at `cap` (cap is pre-rounded to a
    multiple of `unit`).  If the array dim is smaller than one tile unit we
    return the full dim, which is always a legal block shape.
    The grid uses pl.cdiv, so the last block may be ragged (masked)."""
    if dim < unit:
        return dim
    return min((dim // unit) * unit, cap)


def bias_scale_quantize(x, pre_scale, weight_scale, scale,
                        *, lower_bound, upper_bound, M, out_dtype=None,
                        max_block_rows=512, max_block_lanes=2048):
    """x: (N, C, H, W) float32; per-channel params shaped (1, C, 1, 1).

    out_dtype: optional override.  Default keeps the PyTorch contract (same
    dtype as x).  Passing jnp.int8 (bounds fit) is the bandwidth-optimal fast
    path on this HBM-bound kernel.
    """
    N, C, H, W = x.shape
    out_dtype = x.dtype if out_dtype is None else jnp.dtype(out_dtype)
    out_itemsize = jnp.dtype(out_dtype).itemsize

    # --- tiny per-channel precompute (C floats), bit-identical to reference ---
    gam = jnp.round(pre_scale * weight_scale / scale * (2.0 ** M))   # (1,C,1,1)
    g = (gam * (2.0 ** (-(M - 1)))).astype(jnp.float32)              # exact pow2

    # --- lane-dense 2D view: rows = N*C (per-channel), lanes = H*W ---
    R, L = N * C, H * W
    x2 = x.reshape(R, L)
    g_col = jnp.broadcast_to(g.reshape(1, C, 1), (N, C, 1)).reshape(R, 1)

    # Row tile unit: respect the minimum tile of the narrowest dtype touched
    # along the sublane axis (int8 -> 32, bf16/f16 -> 16, f32 -> 8).
    row_unit = {1: 32, 2: 16}.get(out_itemsize, 8)
    lane_unit = 128
    cap_rows = max(row_unit, (max_block_rows // row_unit) * row_unit)
    cap_lanes = max(lane_unit, (max_block_lanes // lane_unit) * lane_unit)

    tr = _block_dim(R, row_unit, cap_rows)
    tc = _block_dim(L, lane_unit, cap_lanes)
    grid = (pl.cdiv(R, tr), pl.cdiv(L, tc))     # lane axis innermost

    # Double-buffered VMEM footprint (x + out + g) with headroom; keep well
    # under v7x's 64 MiB physical VMEM while raising v5e's 16 MiB scoped default.
    db_bytes = 2 * (tr * tc * 4 + tr * tc * out_itemsize + tr * 4)
    vmem_limit = min(max(int(db_bytes * 1.5), 32 * 1024 * 1024), 48 * 1024 * 1024)

    kernel = functools.partial(
        _bias_scale_quant_kernel,
        lower_bound=float(lower_bound),
        upper_bound=float(upper_bound),
    )

    x_spec = pl.BlockSpec((tr, tc), lambda i, j: (i, j))
    g_spec = pl.BlockSpec((tr, 1), lambda i, j: (i, 0))   # constant over inner j

    out2 = pl.pallas_call(
        kernel,
        out_shape=jax.ShapeDtypeStruct((R, L), out_dtype),
        grid_spec=pltpu.PrefetchScalarGridSpec(
            num_scalar_prefetch=0,
            grid=grid,
            in_specs=[x_spec, g_spec],
            out_specs=pl.BlockSpec((tr, tc), lambda i, j: (i, j)),
        ),
        compiler_params=pltpu.CompilerParams(
            dimension_semantics=("parallel", "parallel"),
            vmem_limit_bytes=vmem_limit),
        cost_estimate=pl.CostEstimate(
            flops=5 * R * L,
            transcendentals=0,
            bytes_accessed=R * L * 4 + R * L * out_itemsize + R * 4),
    )(x2, g_col)

    return out2.reshape(N, C, H, W)


def _reference(x, pre_scale, weight_scale, scale, *, lower_bound, upper_bound, M):
    gam = jnp.round(pre_scale * weight_scale / scale * 2.0 ** M)
    y = x * gam
    y = y / 2.0 ** (M - 1)
    y = jnp.floor(y)
    y = jnp.ceil(y / 2.0)
    return jnp.clip(y, lower_bound, upper_bound)


if __name__ == "__main__":
    key = jax.random.PRNGKey(0)
    k_x, k_p, k_w, k_s, k_x2 = jax.random.split(key, 5)

    M = 8
    upper_bound, lower_bound = 127, -128

    # --- Test 1: PyTorch contract (float32 out), lane-aligned shape ---------
    N, C, H, W = 2, 4, 16, 16
    x = jax.random.normal(k_x, (N, C, H, W), dtype=jnp.float32) * 10.0
    pre_scale = jax.random.uniform(k_p, (1, C, 1, 1), dtype=jnp.float32,
                                   minval=0.5, maxval=1.5)
    weight_scale = jax.random.uniform(k_w, (1, C, 1, 1), dtype=jnp.float32,
                                      minval=0.01, maxval=0.1)
    scale = jax.random.uniform(k_s, (1, C, 1, 1), dtype=jnp.float32,
                               minval=0.05, maxval=0.2)

    ref = _reference(x, pre_scale, weight_scale, scale,
                     lower_bound=lower_bound, upper_bound=upper_bound, M=M)

    out = bias_scale_quantize(x, pre_scale, weight_scale, scale,
                              lower_bound=lower_bound,
                              upper_bound=upper_bound, M=M)
    out = jax.block_until_ready(out)
    assert out.shape == (N, C, H, W) and out.dtype == jnp.float32
    assert jnp.allclose(out, ref, atol=0.0), "float32 path mismatch vs reference"

    # --- Test 2: int8 fast path (bandwidth-optimal output) ------------------
    out_i8 = bias_scale_quantize(x, pre_scale, weight_scale, scale,
                                 lower_bound=lower_bound,
                                 upper_bound=upper_bound, M=M,
                                 out_dtype=jnp.int8)
    out_i8 = jax.block_until_ready(out_i8)
    assert out_i8.dtype == jnp.int8
    assert jnp.allclose(out_i8.astype(jnp.float32), ref, atol=0.0), \
        "int8 path mismatch vs reference"

    # --- Test 3: ragged shapes exercising the cdiv grid (masked last blocks) -
    N2, C2, H2, W2 = 3, 5, 9, 20        # R=15 (not /8), L=180 (not /128)
    x_r = jax.random.normal(k_x2, (N2, C2, H2, W2), dtype=jnp.float32) * 5.0
    ps_r = jnp.linspace(0.5, 1.5, C2, dtype=jnp.float32).reshape(1, C2, 1, 1)
    ws_r = jnp.linspace(0.01, 0.1, C2, dtype=jnp.float32).reshape(1, C2, 1, 1)
    sc_r = jnp.linspace(0.05, 0.2, C2, dtype=jnp.float32).reshape(1, C2, 1, 1)

    ref_r = _reference(x_r, ps_r, ws_r, sc_r,
                       lower_bound=lower_bound, upper_bound=upper_bound, M=M)
    out_r = bias_scale_quantize(x_r, ps_r, ws_r, sc_r,
                                lower_bound=lower_bound,
                                upper_bound=upper_bound, M=M,
                                max_block_rows=8, max_block_lanes=128)
    out_r = jax.block_until_ready(out_r)
    assert out_r.shape == (N2, C2, H2, W2)
    assert jnp.allclose(out_r, ref_r, atol=0.0), "ragged-grid path mismatch"

    print("KERNEL_OK")
</pallas_src>

<mosaic_0001>
module attributes {stable_mosaic.version = 11 : i64} {
  func.func @_bias_scale_quant_kernel(%arg0: i32, %arg1: i32, %arg2: memref<8x256xf32, #tpu.memory_space<vmem>>, %arg3: memref<8x1xf32, #tpu.memory_space<vmem>>, %arg4: memref<8x256xf32, #tpu.memory_space<vmem>>) attributes {dimension_semantics = [#tpu.dimension_semantics<parallel>, #tpu.dimension_semantics<parallel>], iteration_bounds = array<i64: 1, 1>, scalar_prefetch = 0 : i64, scratch_operands = 0 : i64, tpu.core_type = #tpu.core_type<tc>, window_params = [{transform_indices = @transform_0, window_bounds = array<i64: 8, 256>}, {transform_indices = @transform_1, window_bounds = array<i64: 8, 1>}, {transform_indices = @transform_2, window_bounds = array<i64: 8, 256>}]} {
    %c0 = arith.constant 0 : index
    %c0_0 = arith.constant 0 : index
    %0 = vector.load %arg2[%c0, %c0_0] : memref<8x256xf32, #tpu.memory_space<vmem>>, vector<8x256xf32>
    %c0_1 = arith.constant 0 : index
    %c0_2 = arith.constant 0 : index
    %1 = vector.load %arg3[%c0_1, %c0_2] : memref<8x1xf32, #tpu.memory_space<vmem>>, vector<8x1xf32>
    %2 = vector.broadcast %1 : vector<8x1xf32> to vector<8x256xf32>
    %3 = arith.mulf %0, %2 : vector<8x256xf32>
    %4 = math.floor %3 : vector<8x256xf32>
    %cst = arith.constant 5.000000e-01 : f32
    %5 = vector.broadcast %cst : f32 to vector<8x256xf32>
    %6 = arith.mulf %4, %5 : vector<8x256xf32>
    %7 = math.ceil %6 : vector<8x256xf32>
    %cst_3 = arith.constant -1.280000e+02 : f32
    %cst_4 = arith.constant 1.270000e+02 : f32
    %8 = vector.broadcast %cst_3 : f32 to vector<8x256xf32>
    %9 = arith.maximumf %8, %7 : vector<8x256xf32>
    %10 = vector.broadcast %cst_4 : f32 to vector<8x256xf32>
    %11 = arith.minimumf %10, %9 : vector<8x256xf32>
    %c0_5 = arith.constant 0 : index
    %c0_6 = arith.constant 0 : index
    %12 = vector.load %arg4[%c0_5, %c0_6] : memref<8x256xf32, #tpu.memory_space<vmem>>, vector<8x256xf32>
    tpu.vector_store %arg4[%c0_5, %c0_6], %11 {strides = array<i32>} : memref<8x256xf32, #tpu.memory_space<vmem>>, vector<8x256xf32>,
    return
  }
  func.func @transform_0(%arg0: i32, %arg1: i32) -> (i32, i32) {
    %c0_i32 = arith.constant 0 : i32
    return %arg0, %arg1 : i32, i32
  }
  func.func @transform_1(%arg0: i32, %arg1: i32) -> (i32, i32) {
    %c0_i32 = arith.constant 0 : i32
    %c0_i32_0 = arith.constant 0 : i32
    return %arg0, %c0_i32 : i32, i32
  }
  func.func @transform_2(%arg0: i32, %arg1: i32) -> (i32, i32) {
    %c0_i32 = arith.constant 0 : i32
    return %arg0, %arg1 : i32, i32
  }
}

</mosaic_0001>

<bundles_post_ra>
// kernel: tpu_custom_call.1
= control target key start
LH: loop header
LB: loop body
LE: loop exit
PB: predicated region body
PF: predicated region fallthrough
CT: control target
= control target key end

     0   :  { %7 = vsyncpa [#allocation3], 0  ;;  %s158_s0 = inlined_call_operand.hbm [shape: f32[8,256], index: 0, kind: input, shape index: {}]   ;;  %s159_s1 = inlined_call_operand.vmem [shape: f32[8,1], index: 1, kind: input, shape index: {}]   ;;  %s160_s2 = inlined_call_operand.hbm [shape: f32[8,256], index: 2, kind: output, shape index: {}]  }
   0x1   :  { %8 = vsyncpa [#allocation4], 0  ;;  %s113_s9 = smov [#allocation2]   ;;  %s65_s13 = scalar_lea.hbm %s158_s0, 256 }
   0x2   :  { %s15_s10 = sshll.u32 %s113_s9, 4  ;;  %p66_p0 = scmp.ne.s32.totalorder %s158_s0, %s65_s13  ;;  %s16_s10 = int_to_ptr.vmem [resolvable:$true] %s15_s10 }
   0x3   :  { %p69_p1 = scmp.lt.u32.totalorder %s65_s13, %s158_s0 }
   0x5   :  { %p71_p2 = pnand %p69_p1, %p66_p0 }
   0x7   :  { %74 = shalt.err (!%p71_p2)
}
   0x8   :  { %s75_s18 = scalar_lea.vmem %s16_s10, 256  ;;  %p80_p4 = scmp.lt.s32.totalorder %s16_s10, %s16_s10 }
   0x9   :  { %p76_p3 = scmp.ne.s32.totalorder %s16_s10, %s75_s18  ;;  %p81_p5 = scmp.lt.s32.totalorder %s75_s18, %s75_s18 }
   0xb   :  { %p82_p6 = por %p81_p5, %p80_p4 }
   0xd   :  { %p83_p7 = pnand %p82_p6, %p76_p3 }
   0xf   :  { %86 = shalt.err (!%p83_p7)
}
  0x10   :  { %18 = dma.hbm_to_vmem [thread:$0]  %s158_s0, 256, %s16_s10, [#allocation3]  }
  0x11   :  { %109 = dma.done.wait [#allocation3], 256  }
  0x12   :  { %110 = vsyncadd [#allocation3], 4294967040  ;;  %v114_v0 = vmov 0   ;;  %v26_v1 = vld [vmem:[%s159_s1] sm:$0xff]  ;;  %v25_v3 = vld [vmem:[#allocation2 + $0x8] sm:$0xff]  ;;  %s115_s0 = smov [#allocation5]  }
  0x13   :  { %64 = vset.pattern.permute.xlu0 %v114_v0  ;;  %v24_v2 = vld [vmem:[#allocation2] sm:$0xff]  ;;  %s52_s23 = sshll.u32 %s115_s0, 4  ;;  %s53_s23 = int_to_ptr.vmem [resolvable:$true] %s52_s23 }
  0x14   :  { %29 = vperm.xlu0 %64, %v26_v1   ;;  %s87_s1 = scalar_lea.vmem %s53_s23, 256  ;;  %p92_p9 = scmp.lt.s32.totalorder %s53_s23, %s53_s23 }
  0x15   :  { %p88_p8 = scmp.ne.s32.totalorder %s53_s23, %s87_s1  ;;  %p93_p10 = scmp.lt.s32.totalorder %s87_s1, %s87_s1 }
  0x17   :  { %p94_p11 = por %p93_p10, %p92_p9 }
  0x19   :  { %p95_p12 = pnand %p94_p11, %p88_p8 }
  0x93   :  { %v30_v4 = vpop.permute.xlu0 %29 }
  0x94   :  { %v32_v5 = vmul.f32 %v30_v4, %v24_v2  ;;  %v33_v6 = vmul.f32 %v30_v4, %v25_v3 }
  0x96   :  { %v34_v7 = vfloor.f32 %v32_v5  ;;  %v35_v8 = vfloor.f32 %v33_v6 }
  0x98   :  { %v36_v9 = vmul.f32 0.5, %v34_v7  ;;  %v37_v10 = vmul.f32 0.5, %v35_v8 }
  0x9a   :  { %v38_v11 = vceil.f32 %v36_v9  ;;  %v39_v12 = vceil.f32 %v37_v10 }
  0x9c   :  { %v40_v13 = vmax.f32 %v38_v11, -128.0  ;;  %v41_v14 = vmax.f32 %v39_v12, -128.0 }
  0x9e   :  { %v42_v15 = vmin.f32 %v40_v13, 127.0  ;;  %v43_v16 = vmin.f32 %v41_v14, 127.0 }
  0xa0   :  { %44 = vst [vmem:[#allocation5] sm:$0xff] %v42_v15  ;;  %45 = vst [vmem:[#allocation5 + $0x8] sm:$0xff] %v43_v16 }
  0xa1   :  { %98 = shalt.err (!%p95_p12)
}
  0xa2   :  { %s99_s26 = scalar_lea.hbm %s160_s2, 256 }
  0xa3   :  { %p100_p13 = scmp.ne.s32.totalorder %s160_s2, %s99_s26  ;;  %p103_p0 = scmp.lt.u32.totalorder %s99_s26, %s160_s2 }
  0xa5   :  { %p105_p1 = pnand %p103_p0, %p100_p13 }
  0xa7   :  { %108 = shalt.err (!%p105_p1)
}
  0xa8   :  { %55 = dma.vmem_to_hbm [thread:$0]  %s53_s23, 256, %s160_s2, [#allocation4]  }
  0xa9   :  { %111 = dma.done.wait [#allocation4], 256  }
  0xaa   :  { %112 = vsyncadd [#allocation4], 4294967040 }
  0xab   :  { %59 = vsyncpa [#allocation3], 1 }
  0xac   :  { %60 = vsyncpa [#allocation4], 1 }

</bundles_post_ra>
